<compile_context>
chip_gen: v5e
topology: v5e:2x2
jax: 0.10.0
libtpu: 0.0.40
codegen_flags: <defaults>
</compile_context>

<pallas_src>
import math

import jax
import jax.numpy as jnp
from jax.experimental import pallas as pl
from jax.experimental.pallas import tpu as pltpu


def _round_up(x, m):
    return ((x + m - 1) // m) * m


def _vmem_budget_bytes():
    """~80% of physical per-core VMEM (generation aware); 64 MiB fallback."""
    cap = 64 * 1024 * 1024
    try:
        info = pltpu.get_tpu_info()
        cap = int(getattr(info, "vmem_capacity_bytes", cap)) or cap
    except Exception:
        pass
    return int(cap * 0.80)


# ---------------------------------------------------------------------------
# Kernel.  Grid = (i over M tiles, k over H tiles); k (reduction) innermost.
# ---------------------------------------------------------------------------
def ffn_kernel(x_ref, w1_ref, b1_ref, w2_ref, b2_ref, o_ref):
    # x_ref : (tm, D_pad)   compute dtype   block (i, 0) -- resident across k
    # w1_ref: (D_pad, th)   compute dtype   block (0, k) -- streamed once per i
    # b1_ref: (1, th)       f32             block (0, k)
    # w2_ref: (th, O_pad)   compute dtype   block (k, 0) -- streamed once per i
    # b2_ref: (1, O_pad)    f32             block (0, 0)
    # o_ref : (tm, O_pad)   f32             block (i, 0) -- resident accumulator
    k = pl.program_id(1)

    @pl.when(k == 0)
    def _():
        o_ref[...] = jnp.zeros_like(o_ref)

    # GEMM 1 on the MXU (f32 accumulation); bias + ReLU epilogue in f32 (VPU).
    h = jnp.dot(x_ref[...], w1_ref[...], preferred_element_type=jnp.float32)
    h = jnp.maximum(h + b1_ref[...], 0.0)

    # GEMM 2: accumulate this hidden tile's contribution into the resident
    # f32 output block (no separate scratch accumulator).
    o_ref[...] += jnp.dot(h.astype(w2_ref.dtype), w2_ref[...],
                          preferred_element_type=jnp.float32)

    @pl.when(k == pl.num_programs(1) - 1)
    def _():
        o_ref[...] += b2_ref[...]


# ---------------------------------------------------------------------------
# One-time weight preparation (hoisted out of the per-call hot path).
# ---------------------------------------------------------------------------
def prepare_ffn_params(w1, b1, w2, b2, *, th=512, compute_dtype=jnp.bfloat16):
    """Pad + cast weights once at model load.

    w1: (D, H), b1: (H,), w2: (H, O), b2: (O,)  -- weights stored [in, out].
    """
    d, h = w1.shape
    o = w2.shape[1]

    # MXU-friendly hidden tile: 256-wide passes on v6e/v7x when H allows.
    gran = 128 if h <= 128 else 256
    th_eff = min(_round_up(th, gran), _round_up(h, gran))
    d_pad = _round_up(d, 128)
    h_pad = _round_up(h, th_eff)
    o_pad = _round_up(o, 128)

    f32 = jnp.float32
    w1p = jnp.pad(w1.astype(f32),
                  ((0, d_pad - d), (0, h_pad - h))).astype(compute_dtype)
    w2p = jnp.pad(w2.astype(f32),
                  ((0, h_pad - h), (0, o_pad - o))).astype(compute_dtype)
    b1p = jnp.pad(b1.astype(f32), (0, h_pad - h)).reshape(1, h_pad)
    b2p = jnp.pad(b2.astype(f32), (0, o_pad - o)).reshape(1, o_pad)

    return dict(w1=w1p, b1=b1p, w2=w2p, b2=b2p,
                d=d, h=h, o=o, d_pad=d_pad, h_pad=h_pad, o_pad=o_pad,
                th=th_eff, compute_dtype=jnp.dtype(compute_dtype))


# ---------------------------------------------------------------------------
# Per-call forward.
# ---------------------------------------------------------------------------
def feed_forward(x, params, *, tm=512):
    """x: (..., D). Returns (..., O) in float32 (matches `x.float()` module)."""
    w1p, b1p, w2p, b2p = params["w1"], params["b1"], params["w2"], params["b2"]
    d, h, o = params["d"], params["h"], params["o"]
    d_pad, h_pad, o_pad = params["d_pad"], params["h_pad"], params["o_pad"]
    th = params["th"]
    compute_dtype = params["compute_dtype"]
    in_sz = compute_dtype.itemsize

    x = x.astype(jnp.float32)                      # x = x.float()
    *lead, dx = x.shape
    assert dx == d, f"input dim {dx} != prepared dim {d}"
    m = math.prod(lead) if lead else 1

    # Row tile: sublane-packing aware (16 rows for bf16, 8 for f32).
    pack = 8 * (4 // in_sz)
    budget = _vmem_budget_bytes()
    tm_eff = max(pack, min(_round_up(tm, pack), _round_up(m, pack)))
    # v7x has two TensorCores: keep >= 2 M tiles for medium/large batches so
    # the "parallel" i axis can shard across both cores.
    if 256 <= m <= tm_eff:
        tm_eff = max(pack, _round_up((m + 1) // 2, pack))
    th_eff = th

    def footprint(tm_, th_):
        # Pallas double-buffers every pipelined block (inputs and output).
        return 2 * (tm_ * d_pad * in_sz          # x tile
                    + d_pad * th_ * in_sz        # W1 tile
                    + th_ * 4                    # b1 tile
                    + th_ * o_pad * in_sz        # W2 tile
                    + o_pad * 4                  # b2
                    + tm_ * o_pad * 4)           # f32 output/accumulator tile

    while footprint(tm_eff, th_eff) > budget and tm_eff > pack:
        tm_eff = max(pack, _round_up(tm_eff // 2, pack))
    while (footprint(tm_eff, th_eff) > budget and th_eff > 128
           and (th_eff // 2) % 128 == 0 and h_pad % (th_eff // 2) == 0):
        th_eff //= 2
    # TODO(synk): for very large D / O the (tm, D) x-tile or the (tm, O_pad)
    # resident accumulator may still exceed v7x's 64 MiB VMEM; in that regime
    # tile the D contraction and the O dimension (with an h-cache scratch).

    m_pad = _round_up(m, tm_eff)
    x2 = jnp.pad(x.reshape(m, d),
                 ((0, m_pad - m), (0, d_pad - d))).astype(compute_dtype)

    grid = (m_pad // tm_eff, h_pad // th_eff)
    n_m_tiles = grid[0]

    vmem_limit = int(min(budget,
                         max(footprint(tm_eff, th_eff) * 5 // 4 + (2 << 20),
                             32 * 1024 * 1024)))

    # Cost estimate matches the real schedule: each GEMM done exactly once,
    # weights streamed once per M tile, output written once.
    cost = pl.CostEstimate(
        flops=2 * m_pad * d_pad * h_pad + 2 * m_pad * h_pad * o_pad,
        transcendentals=0,
        bytes_accessed=(m_pad * d_pad * in_sz
                        + n_m_tiles * (d_pad * h_pad + h_pad * o_pad) * in_sz
                        + n_m_tiles * h_pad * 4 + o_pad * 4
                        + m_pad * o_pad * 4),
    )

    out = pl.pallas_call(
        ffn_kernel,
        out_shape=jax.ShapeDtypeStruct((m_pad, o_pad), jnp.float32),
        grid_spec=pltpu.PrefetchScalarGridSpec(
            num_scalar_prefetch=0,
            grid=grid,
            in_specs=[
                pl.BlockSpec((tm_eff, d_pad), lambda i, k: (i, 0)),   # x rows
                pl.BlockSpec((d_pad, th_eff), lambda i, k: (0, k)),   # W1 tile
                pl.BlockSpec((1, th_eff),     lambda i, k: (0, k)),   # b1 tile
                pl.BlockSpec((th_eff, o_pad), lambda i, k: (k, 0)),   # W2 tile
                pl.BlockSpec((1, o_pad),      lambda i, k: (0, 0)),   # b2
            ],
            out_specs=pl.BlockSpec((tm_eff, o_pad), lambda i, k: (i, 0)),
        ),
        compiler_params=pltpu.CompilerParams(
            dimension_semantics=("parallel", "arbitrary"),
            vmem_limit_bytes=vmem_limit,
        ),
        cost_estimate=cost,
    )(x2, w1p, b1p, w2p, b2p)

    return out[:m, :o].reshape(*lead, o)


# ---------------------------------------------------------------------------
# Pure-JAX reference replicating the kernel's dtype path.
# ---------------------------------------------------------------------------
def ffn_reference(x, w1, b1, w2, b2, compute_dtype=jnp.float32):
    xc = x.astype(jnp.float32).astype(compute_dtype)
    h = jnp.dot(xc, w1.astype(compute_dtype),
                preferred_element_type=jnp.float32) + b1.astype(jnp.float32)
    h = jnp.maximum(h, 0.0)
    y = jnp.dot(h.astype(compute_dtype), w2.astype(compute_dtype),
                preferred_element_type=jnp.float32) + b2.astype(jnp.float32)
    return y


def init_feed_forward_params(key, input_dim, hidden_dim, output_dim):
    """nn.Linear-style init (uniform +-1/sqrt(fan_in)); weights stored [in, out]."""
    k1, k2, k3, k4 = jax.random.split(key, 4)
    lim1 = 1.0 / (input_dim ** 0.5)
    lim2 = 1.0 / (hidden_dim ** 0.5)
    w1 = jax.random.uniform(k1, (input_dim, hidden_dim), jnp.float32, -lim1, lim1)
    b1 = jax.random.uniform(k2, (hidden_dim,), jnp.float32, -lim1, lim1)
    w2 = jax.random.uniform(k3, (hidden_dim, output_dim), jnp.float32, -lim2, lim2)
    b2 = jax.random.uniform(k4, (output_dim,), jnp.float32, -lim2, lim2)
    return w1, b1, w2, b2


if __name__ == "__main__":
    key = jax.random.PRNGKey(0)
    kx, kp, kx2, kp2 = jax.random.split(key, 4)

    # ---- test 1: aligned toy shape, exact f32 path ----
    batch, seq = 2, 8
    input_dim, hidden_dim, output_dim = 32, 64, 32
    x = jax.random.normal(kx, (batch, seq, input_dim), dtype=jnp.float32)
    w1, b1, w2, b2 = init_feed_forward_params(kp, input_dim, hidden_dim, output_dim)

    params_f32 = prepare_ffn_params(w1, b1, w2, b2, compute_dtype=jnp.float32)
    out_f32 = jax.block_until_ready(feed_forward(x, params_f32))
    ref_f32 = ffn_reference(x, w1, b1, w2, b2, jnp.float32)
    assert out_f32.shape == (batch, seq, output_dim)
    assert jnp.allclose(out_f32, ref_f32, atol=1e-4, rtol=1e-4)

    # ---- test 2: same shape, bf16 MXU path (perf configuration) ----
    params_bf16 = prepare_ffn_params(w1, b1, w2, b2, compute_dtype=jnp.bfloat16)
    out_bf16 = jax.block_until_ready(feed_forward(x, params_bf16))
    ref_bf16 = ffn_reference(x, w1, b1, w2, b2, jnp.bfloat16)
    assert jnp.allclose(out_bf16, ref_bf16, atol=2e-2, rtol=2e-2)

    # ---- test 3: ragged, unaligned shapes exercise the padding path ----
    b3, s3, d3, h3, o3 = 3, 5, 48, 200, 72
    x3 = jax.random.normal(kx2, (b3, s3, d3), dtype=jnp.float32)
    w1r, b1r, w2r, b2r = init_feed_forward_params(kp2, d3, h3, o3)
    params3 = prepare_ffn_params(w1r, b1r, w2r, b2r, compute_dtype=jnp.float32)
    out3 = jax.block_until_ready(feed_forward(x3, params3))
    ref3 = ffn_reference(x3, w1r, b1r, w2r, b2r, jnp.float32)
    assert out3.shape == (b3, s3, o3)
    assert jnp.allclose(out3, ref3, atol=1e-4, rtol=1e-4)

    print("KERNEL_OK")
</pallas_src>

<mosaic_0001>
module attributes {stable_mosaic.version = 11 : i64} {
  func.func @ffn_kernel(%arg0: i32, %arg1: i32, %arg2: memref<16x128xf32, #tpu.memory_space<vmem>>, %arg3: memref<128x128xf32, #tpu.memory_space<vmem>>, %arg4: memref<1x128xf32, #tpu.memory_space<vmem>>, %arg5: memref<128x128xf32, #tpu.memory_space<vmem>>, %arg6: memref<1x128xf32, #tpu.memory_space<vmem>>, %arg7: memref<16x128xf32, #tpu.memory_space<vmem>>) attributes {dimension_semantics = [#tpu.dimension_semantics<parallel>, #tpu.dimension_semantics<arbitrary>], iteration_bounds = array<i64: 1, 1>, scalar_prefetch = 0 : i64, scratch_operands = 0 : i64, tpu.core_type = #tpu.core_type<tc>, window_params = [{transform_indices = @transform_0, window_bounds = array<i64: 16, 128>}, {transform_indices = @transform_1, window_bounds = array<i64: 128, 128>}, {transform_indices = @transform_2, window_bounds = array<i64: 1, 128>}, {transform_indices = @transform_3, window_bounds = array<i64: 128, 128>}, {pipeline_mode = #tpu.pipeline_mode<synchronous>, transform_indices = @transform_4, window_bounds = array<i64: 1, 128>}, {transform_indices = @transform_5, window_bounds = array<i64: 16, 128>}]} {
    %c0_i32 = arith.constant 0 : i32
    %0 = arith.cmpi eq, %arg1, %c0_i32 : i32
    %1 = arith.extui %0 : i1 to i32
    %c0_i32_0 = arith.constant 0 : i32
    %2 = arith.cmpi ne, %1, %c0_i32_0 : i32
    scf.if %2 {
      %cst_16 = arith.constant 0.000000e+00 : f32
      %19 = vector.broadcast %cst_16 : f32 to vector<16x128xf32>
      %c0_17 = arith.constant 0 : index
      %c0_18 = arith.constant 0 : index
      %20 = vector.load %arg7[%c0_17, %c0_18] : memref<16x128xf32, #tpu.memory_space<vmem>>, vector<16x128xf32>
      tpu.vector_store %arg7[%c0_17, %c0_18], %19 {strides = array<i32>} : memref<16x128xf32, #tpu.memory_space<vmem>>, vector<16x128xf32>,
    } else {
    }
    %c0 = arith.constant 0 : index
    %c0_1 = arith.constant 0 : index
    %3 = vector.load %arg2[%c0, %c0_1] : memref<16x128xf32, #tpu.memory_space<vmem>>, vector<16x128xf32>
    %c0_2 = arith.constant 0 : index
    %c0_3 = arith.constant 0 : index
    %4 = vector.load %arg3[%c0_2, %c0_3] : memref<128x128xf32, #tpu.memory_space<vmem>>, vector<128x128xf32>
    %cst = arith.constant dense<0.000000e+00> : vector<16x128xf32>
    %5 = tpu.matmul %3, %4, %cst {dimension_numbers = #tpu.dot_dimension_numbers<[1], [0], [0], [1], [0, 0, 1, 1], [], []>} : vector<16x128xf32>, vector<128x128xf32>, vector<16x128xf32> -> vector<16x128xf32>
    %c0_4 = arith.constant 0 : index
    %c0_5 = arith.constant 0 : index
    %6 = vector.load %arg4[%c0_4, %c0_5] : memref<1x128xf32, #tpu.memory_space<vmem>>, vector<1x128xf32>
    %7 = vector.broadcast %6 : vector<1x128xf32> to vector<16x128xf32>
    %8 = arith.addf %5, %7 : vector<16x128xf32>
    %cst_6 = arith.constant 0.000000e+00 : f32
    %9 = vector.broadcast %cst_6 : f32 to vector<16x128xf32>
    %10 = arith.maximumf %8, %9 : vector<16x128xf32>
    %c0_7 = arith.constant 0 : index
    %c0_8 = arith.constant 0 : index
    %11 = vector.load %arg7[%c0_7, %c0_8] : memref<16x128xf32, #tpu.memory_space<vmem>>, vector<16x128xf32>
    %c0_9 = arith.constant 0 : index
    %c0_10 = arith.constant 0 : index
    %12 = vector.load %arg5[%c0_9, %c0_10] : memref<128x128xf32, #tpu.memory_space<vmem>>, vector<128x128xf32>
    %cst_11 = arith.constant dense<0.000000e+00> : vector<16x128xf32>
    %13 = tpu.matmul %10, %12, %cst_11 {dimension_numbers = #tpu.dot_dimension_numbers<[1], [0], [0], [1], [0, 0, 1, 1], [], []>} : vector<16x128xf32>, vector<128x128xf32>, vector<16x128xf32> -> vector<16x128xf32>
    %14 = arith.addf %11, %13 : vector<16x128xf32>
    %c0_12 = arith.constant 0 : index
    %c0_13 = arith.constant 0 : index
    %15 = vector.load %arg7[%c0_12, %c0_13] : memref<16x128xf32, #tpu.memory_space<vmem>>, vector<16x128xf32>
    tpu.vector_store %arg7[%c0_12, %c0_13], %14 {strides = array<i32>} : memref<16x128xf32, #tpu.memory_space<vmem>>, vector<16x128xf32>,
    %c0_i32_14 = arith.constant 0 : i32
    %16 = arith.cmpi eq, %arg1, %c0_i32_14 : i32
    %17 = arith.extui %16 : i1 to i32
    %c0_i32_15 = arith.constant 0 : i32
    %18 = arith.cmpi ne, %17, %c0_i32_15 : i32
    scf.if %18 {
      %c0_16 = arith.constant 0 : index
      %c0_17 = arith.constant 0 : index
      %19 = vector.load %arg7[%c0_16, %c0_17] : memref<16x128xf32, #tpu.memory_space<vmem>>, vector<16x128xf32>
      %c0_18 = arith.constant 0 : index
      %c0_19 = arith.constant 0 : index
      %20 = vector.load %arg6[%c0_18, %c0_19] : memref<1x128xf32, #tpu.memory_space<vmem>>, vector<1x128xf32>
      %21 = vector.broadcast %20 : vector<1x128xf32> to vector<16x128xf32>
      %22 = arith.addf %19, %21 : vector<16x128xf32>
      %c0_20 = arith.constant 0 : index
      %c0_21 = arith.constant 0 : index
      %23 = vector.load %arg7[%c0_20, %c0_21] : memref<16x128xf32, #tpu.memory_space<vmem>>, vector<16x128xf32>
      tpu.vector_store %arg7[%c0_20, %c0_21], %22 {strides = array<i32>} : memref<16x128xf32, #tpu.memory_space<vmem>>, vector<16x128xf32>,
    } else {
    }
    return
  }
  func.func @transform_0(%arg0: i32, %arg1: i32) -> (i32, i32) {
    %c0_i32 = arith.constant 0 : i32
    %c0_i32_0 = arith.constant 0 : i32
    return %arg0, %c0_i32 : i32, i32
  }
  func.func @transform_1(%arg0: i32, %arg1: i32) -> (i32, i32) {
    %c0_i32 = arith.constant 0 : i32
    %c0_i32_0 = arith.constant 0 : i32
    return %c0_i32, %arg1 : i32, i32
  }
  func.func @transform_2(%arg0: i32, %arg1: i32) -> (i32, i32) {
    %c0_i32 = arith.constant 0 : i32
    %c0_i32_0 = arith.constant 0 : i32
    return %c0_i32, %arg1 : i32, i32
  }
  func.func @transform_3(%arg0: i32, %arg1: i32) -> (i32, i32) {
    %c0_i32 = arith.constant 0 : i32
    %c0_i32_0 = arith.constant 0 : i32
    return %arg1, %c0_i32 : i32, i32
  }
  func.func @transform_4(%arg0: i32, %arg1: i32) -> (i32, i32) {
    %c0_i32 = arith.constant 0 : i32
    %c0_i32_0 = arith.constant 0 : i32
    %c0_i32_1 = arith.constant 0 : i32
    return %c0_i32, %c0_i32_0 : i32, i32
  }
  func.func @transform_5(%arg0: i32, %arg1: i32) -> (i32, i32) {
    %c0_i32 = arith.constant 0 : i32
    %c0_i32_0 = arith.constant 0 : i32
    return %arg0, %c0_i32 : i32, i32
  }
}

</mosaic_0001>

<bundles_post_ra>
// kernel: tpu_custom_call.1
= control target key start
LH: loop header
LB: loop body
LE: loop exit
PB: predicated region body
PF: predicated region fallthrough
CT: control target
= control target key end

     0   :  { %10 = vsyncpa [#allocation3], 0  ;;  %s408_s0 = inlined_call_operand.hbm [shape: f32[16,128], index: 0, kind: input, shape index: {}]   ;;  %s409_s1 = inlined_call_operand.hbm [shape: f32[128,128], index: 1, kind: input, shape index: {}]   ;;  %s410_s2 = inlined_call_operand.vmem [shape: f32[1,128], index: 2, kind: input, shape index: {}]   ;;  %s411_s3 = inlined_call_operand.hbm [shape: f32[128,128], index: 3, kind: input, shape index: {}]   ;;  %s412_s4 = inlined_call_operand.vmem [shape: f32[1,128], index: 4, kind: input, shape index: {}]   ;;  %s413_s5 = inlined_call_operand.hbm [shape: f32[16,128], index: 5, kind: output, shape index: {}]  }
   0x1   :  { %11 = vsyncpa [#allocation6], 0 }
   0x2   :  { %12 = vsyncpa [#allocation4], 0  ;;  %s30_s20 = sshll.u32 %s409_s1, 4  ;;  %s342_s21 = smov [#allocation5]   ;;  %s31_s20 = int_to_ptr.hbm [resolvable:$true] %s30_s20 }
   0x3   :  { %s32_s22 = sshll.u32 %s342_s21, 4  ;;  %s17_s25 = sshll.u32 %s408_s0, 4  ;;  %s33_s22 = int_to_ptr.vmem [resolvable:$true] %s32_s22  ;;  %s18_s25 = int_to_ptr.hbm [resolvable:$true] %s17_s25 }
   0x4   :  { %s343_s26 = smov 128   ;;  %s344_s27 = smov 8  }
   0x5   :  { %38 = dma.hbm_to_vmem [thread:$0]  %s31_s20, 2048, %s33_s22, [#allocation6], %s343_s26, %s343_s26, %s344_s27  }
   0x6   :  { %s345_s28 = smov [#allocation2]   ;;  %s45_s1 = sshll.u32 %s411_s3, 4  ;;  %s46_s1 = int_to_ptr.hbm [resolvable:$true] %s45_s1 }
   0x7   :  { %s19_s29 = sshll.u32 %s345_s28, 4  ;;  %s346_s0 = smov [#allocation7]   ;;  %s20_s29 = int_to_ptr.vmem [resolvable:$true] %s19_s29 }
   0x8   :  { %25 = dma.hbm_to_vmem [thread:$0]  %s18_s25, 256, %s20_s29, [#allocation3], %s343_s26, %s343_s26, %s344_s27  }
   0x9   :  { %s47_s7 = sshll.u32 %s346_s0, 4  ;;  %s48_s7 = int_to_ptr.vmem [resolvable:$true] %s47_s7 }
   0xa   :  { %53 = dma.hbm_to_vmem [thread:$0]  %s46_s1, 2048, %s48_s7, [#allocation6], %s343_s26, %s343_s26, %s344_s27  }
   0xb   :  { %336 = dma.done.wait [#allocation3], 256  }
   0xc   :  { %337 = vsyncadd [#allocation3], 4294967040 }
   0xd   :  { %338 = dma.done.wait [#allocation6], 4096  }
   0xe   :  { %339 = vsyncadd [#allocation6], 4294963200  ;;  %v91_v0 = vld [vmem:[#allocation5 + $0x78] sm:$0xff]  ;;  %v90_v1 = vld [vmem:[#allocation5 + $0x70] sm:$0xff]  ;;  %s347_s11 = smov [#allocation8]   ;;  %s185_s14 = sshll.u32 %s413_s5, 4  ;;  %s186_s14 = int_to_ptr.hbm [resolvable:$true] %s185_s14 }
   0xf   :  { %199 = vmatpush.msra.mxu2 %v91_v0  ;;  %96 = vmatpush.msra.mxu0 %v91_v0  ;;  %v89_v2 = vld [vmem:[#allocation5 + $0x68] sm:$0xff]  ;;  %v88_v3 = vld [vmem:[#allocation5 + $0x60] sm:$0xff]  ;;  %v87_v4 = vld [vmem:[#allocation5 + $0x58] sm:$0xff]  ;;  %s183_s12 = sshll.u32 %s347_s11, 4  ;;  %s184_s12 = int_to_ptr.vmem [resolvable:$true] %s183_s12 }
  0x10   :  { %v138_v5 = vld [vmem:[#allocation7 + $0x78] sm:$0xff]  ;;  %v137_v6 = vld [vmem:[#allocation7 + $0x70] sm:$0xff]  ;;  %v136_v8 = vld [vmem:[#allocation7 + $0x68] sm:$0xff] }
  0x11   :  { %200 = vmatpush.msra.mxu2 %v90_v1  ;;  %97 = vmatpush.msra.mxu0 %v90_v1  ;;  %v86_v7 = vld [vmem:[#allocation5 + $0x50] sm:$0xff]  ;;  %v85_v9 = vld [vmem:[#allocation5 + $0x48] sm:$0xff]  ;;  %v135_v10 = vld [vmem:[#allocation7 + $0x60] sm:$0xff] }
  0x12   :  { %215 = vmatpush.msra.mxu3 %v138_v5  ;;  %139 = vmatpush.msra.mxu1 %v138_v5  ;;  %v84_v11 = vld [vmem:[#allocation5 + $0x40] sm:$0xff]  ;;  %v134_v12 = vld [vmem:[#allocation7 + $0x58] sm:$0xff]  ;;  %v133_v14 = vld [vmem:[#allocation7 + $0x50] sm:$0xff] }
  0x13   :  { %201 = vmatpush.msra.mxu2 %v89_v2  ;;  %98 = vmatpush.msra.mxu0 %v89_v2  ;;  %v83_v13 = vld [vmem:[#allocation5 + $0x38] sm:$0xff]  ;;  %v82_v15 = vld [vmem:[#allocation5 + $0x30] sm:$0xff]  ;;  %v132_v16 = vld [vmem:[#allocation7 + $0x48] sm:$0xff] }
  0x14   :  { %216 = vmatpush.msra.mxu3 %v137_v6  ;;  %140 = vmatpush.msra.mxu1 %v137_v6  ;;  %v81_v17 = vld [vmem:[#allocation5 + $0x28] sm:$0xff]  ;;  %v131_v18 = vld [vmem:[#allocation7 + $0x40] sm:$0xff]  ;;  %v130_v20 = vld [vmem:[#allocation7 + $0x38] sm:$0xff] }
  0x15   :  { %202 = vmatpush.msra.mxu2 %v88_v3  ;;  %99 = vmatpush.msra.mxu0 %v88_v3  ;;  %v80_v19 = vld [vmem:[#allocation5 + $0x20] sm:$0xff]  ;;  %v79_v21 = vld [vmem:[#allocation5 + $0x18] sm:$0xff]  ;;  %v129_v22 = vld [vmem:[#allocation7 + $0x30] sm:$0xff] }
  0x16   :  { %217 = vmatpush.msra.mxu3 %v136_v8  ;;  %141 = vmatpush.msra.mxu1 %v136_v8  ;;  %v78_v23 = vld [vmem:[#allocation5 + $0x10] sm:$0xff]  ;;  %v128_v24 = vld [vmem:[#allocation7 + $0x28] sm:$0xff]  ;;  %v127_v26 = vld [vmem:[#allocation7 + $0x20] sm:$0xff] }
  0x17   :  { %203 = vmatpush.msra.mxu2 %v87_v4  ;;  %100 = vmatpush.msra.mxu0 %v87_v4  ;;  %v77_v25 = vld [vmem:[#allocation5 + $0x8] sm:$0xff]  ;;  %v76_v27 = vld [vmem:[#allocation5] sm:$0xff]  ;;  %v75_v28 = vld [vmem:[#allocation2 + $0x8] sm:$0xff] }
  0x18   :  { %218 = vmatpush.msra.mxu3 %v135_v10  ;;  %142 = vmatpush.msra.mxu1 %v135_v10  ;;  %v74_v29 = vld [vmem:[#allocation2] sm:$0xff]  ;;  %v126_v30 = vld [vmem:[#allocation7 + $0x18] sm:$0xff]  ;;  %v124_v32 = vld [vmem:[#allocation7 + $0x8] sm:$0xff] }
  0x19   :  { %204 = vmatpush.msra.mxu2 %v86_v7  ;;  %101 = vmatpush.msra.mxu0 %v86_v7  ;;  %v125_v31 = vld [vmem:[#allocation7 + $0x10] sm:$0xff]  ;;  %v123_v33 = vld [vmem:[#allocation7] sm:$0xff] }
  0x1a   :  { %219 = vmatpush.msra.mxu3 %v134_v12  ;;  %143 = vmatpush.msra.mxu1 %v134_v12  ;;  %v238_v34 = vld [vmem:[%s410_s2] ss:$0 sm:$0xff] }
  0x1b   :  { %205 = vmatpush.msra.mxu2 %v85_v9  ;;  %102 = vmatpush.msra.mxu0 %v85_v9  ;;  %v239_v41 = vld [vmem:[%s412_s4] ss:$0 sm:$0xff] }
  0x1c   :  { %220 = vmatpush.msra.mxu3 %v133_v14  ;;  %144 = vmatpush.msra.mxu1 %v133_v14 }
  0x1d   :  { %206 = vmatpush.msra.mxu2 %v84_v11  ;;  %103 = vmatpush.msra.mxu0 %v84_v11 }
  0x1e   :  { %221 = vmatpush.msra.mxu3 %v132_v16  ;;  %145 = vmatpush.msra.mxu1 %v132_v16 }
  0x1f   :  { %207 = vmatpush.msra.mxu2 %v83_v13  ;;  %104 = vmatpush.msra.mxu0 %v83_v13 }
  0x20   :  { %222 = vmatpush.msra.mxu3 %v131_v18  ;;  %146 = vmatpush.msra.mxu1 %v131_v18 }
  0x21   :  { %208 = vmatpush.msra.mxu2 %v82_v15  ;;  %105 = vmatpush.msra.mxu0 %v82_v15 }
  0x22   :  { %223 = vmatpush.msra.mxu3 %v130_v20  ;;  %147 = vmatpush.msra.mxu1 %v130_v20 }
  0x23   :  { %209 = vmatpush.msra.mxu2 %v81_v17  ;;  %106 = vmatpush.msra.mxu0 %v81_v17 }
  0x24   :  { %224 = vmatpush.msra.mxu3 %v129_v22  ;;  %148 = vmatpush.msra.mxu1 %v129_v22 }
  0x25   :  { %210 = vmatpush.msra.mxu2 %v80_v19  ;;  %107 = vmatpush.msra.mxu0 %v80_v19 }
  0x26   :  { %225 = vmatpush.msra.mxu3 %v128_v24  ;;  %149 = vmatpush.msra.mxu1 %v128_v24 }
  0x27   :  { %211 = vmatpush.msra.mxu2 %v79_v21  ;;  %108 = vmatpush.msra.mxu0 %v79_v21 }
  0x28   :  { %226 = vmatpush.msra.mxu3 %v127_v26  ;;  %150 = vmatpush.msra.mxu1 %v127_v26 }
  0x29   :  { %212 = vmatpush.msra.mxu2 %v78_v23  ;;  %109 = vmatpush.msra.mxu0 %v78_v23 }
  0x2a   :  { %227 = vmatpush.msra.mxu3 %v126_v30  ;;  %151 = vmatpush.msra.mxu1 %v126_v30 }
  0x2b   :  { %213 = vmatpush.msra.mxu2 %v77_v25  ;;  %110 = vmatpush.msra.mxu0 %v77_v25 }
  0x2c   :  { %228 = vmatpush.msra.mxu3 %v125_v31  ;;  %152 = vmatpush.msra.mxu1 %v125_v31 }
  0x2d   :  { %214 = vmatpush.msra.mxu2 %v76_v27  ;;  %111 = vmatpush.msra.mxu0 %v76_v27 }
  0x2e   :  { %115 = vmatmul.f32.vlgmr.msra.gmra.mxu2 %v75_v28  ;;  %112 = vmatmul.f32.vlgmr.msra.gmra.mxu0 %v74_v29 }
  0x2f   :  { %229 = vmatpush.msra.mxu3 %v124_v32  ;;  %153 = vmatpush.msra.mxu1 %v124_v32 }
  0x31   :  { %230 = vmatpush.msra.mxu3 %v123_v33  ;;  %154 = vmatpush.msra.mxu1 %v123_v33 }
  0xab   :  { %v113_v35 = vpop.f32.mrf.mxu0 }
  0xac   :  { %v114_v36 = vadd.f32 %v238_v34, %v113_v35 }
  0xae   :  { %v119_v37 = vmax.f32 %v114_v36, 0.0 }
  0xb0   :  { %155 = vmatmul.f32.vlgmr.msra.gmra.mxu1 %v119_v37 }
  0xb1   :  { %v116_v38 = vpop.f32.mrf.mxu2 }
  0xb2   :  { %v117_v39 = vadd.f32 %v238_v34, %v116_v38 }
  0xb4   :  { %v120_v40 = vmax.f32 %v117_v39, 0.0 }
  0xb6   :  { %158 = vmatmul.f32.vlgmr.msra.gmra.mxu3 %v120_v40 }
 0x12d   :  { %v156_v42 = vpop.f32.mrf.mxu1 }
 0x12e   :  { %v175_v43 = vadd.f32 %v239_v41, %v156_v42 }
 0x130   :  { %177 = vst [vmem:[#allocation8] sm:$0xff] %v175_v43 }
 0x139   :  { %v159_v44 = vpop.f32.mrf.mxu3 }
 0x13a   :  { %v176_v45 = vadd.f32 %v239_v41, %v159_v44 }
 0x13c   :  { %178 = vst [vmem:[#allocation8 + $0x8] sm:$0xff] %v176_v45 }
 0x13d   :  { %191 = dma.vmem_to_hbm [thread:$0]  %s184_s12, 256, %s186_s14, [#allocation4], %s343_s26, %s343_s26, %s344_s27  }
 0x13e   :  { %340 = dma.done.wait [#allocation4], 256  }
 0x13f   :  { %341 = vsyncadd [#allocation4], 4294967040 }
 0x140   :  { %196 = vsyncpa [#allocation3], 1 }
 0x141   :  { %197 = vsyncpa [#allocation6], 1 }
 0x142   :  { %198 = vsyncpa [#allocation4], 1 }

</bundles_post_ra>
